<compile_context>
chip_gen: v7x
topology: tpu7x:2x2x1
jax: 0.10.0
libtpu: 0.0.40
codegen_flags: <defaults>
</compile_context>

<pallas_src>
import jax
import jax.numpy as jnp
from jax.experimental import pallas as pl
from jax.experimental.pallas import tpu as pltpu


def _fpn_block_kernel(skip_ref, w_ref, b_ref, xw_ref, o_ref):
    # skip_ref : (th, W2, Cs)      th output rows of skip
    # w_ref    : (Cs, Cp)          resident conv weight
    # b_ref    : (1, Cp)           resident bias (f32)
    # xw_ref   : (th//2, W2, Cp)   x already repeated along W; H-repeat is done here
    # o_ref    : (th, W2, Cp)
    th, W2, Cs = skip_ref.shape
    Cp = o_ref.shape[-1]

    # 1x1 conv over channels -> single MXU matmul, accumulate in f32.
    skip2d = skip_ref[...].reshape(th * W2, Cs)
    conv = jnp.dot(skip2d, w_ref[...], preferred_element_type=jnp.float32)
    conv = conv + b_ref[...]                            # (th*W2, Cp), f32

    # Fused nearest-neighbour upsample along H: each x row feeds two consecutive
    # output rows, so broadcast over the (pair) axis (leading dims only -> cheap).
    conv = conv.reshape(th // 2, 2, W2, Cp)
    xup = xw_ref[...].astype(jnp.float32)               # (th//2, W2, Cp)
    out = conv + xup[:, None, :, :]                     # (th//2, 2, W2, Cp)
    o_ref[...] = out.reshape(th, W2, Cp).astype(o_ref.dtype)


def _pick_row_block(total_rows, row_bytes, target_bytes=4 << 20):
    """Largest even divisor of total_rows whose block (skip+x+out tiles) stays
    under target_bytes (Pallas double-buffers -> ~2x that in VMEM, well under the
    16/32 MiB scoped defaults on v5e/v6e/v7x), preferring a grid length >= 2 so
    megacore ('parallel') sharding gets balanced work."""
    min_grid = 2 if total_rows >= 4 else 1
    best = 2
    for t in range(2, total_rows + 1, 2):
        if t * row_bytes > target_bytes:
            break                      # monotone in t
        if total_rows % t == 0 and total_rows // t >= min_grid:
            best = t
    return best


def fpn_block(x, skip, weight, bias, *, block_bytes=4 << 20):
    """x: (N,Cp,H,W), skip: (N,Cs,2H,2W), weight: (Cp,Cs,1,1), bias: (Cp,)."""
    N, Cp, H, W = x.shape
    Ns, Cs, H2, W2 = skip.shape
    assert Ns == N and H2 == 2 * H and W2 == 2 * W

    out_dtype = x.dtype
    compute_dtype = skip.dtype   # feed bf16 inputs for ~2x HBM bandwidth if desired

    # NCHW -> channels-last rows (interface glue; delete if the model is NHWC).
    skip_rows = jnp.transpose(skip, (0, 2, 3, 1)).reshape(N * H2, W2, Cs)
    # x: repeat along W only (2x) fused with the transpose pass; the H-direction
    # repeat is folded into the kernel, so x is never amplified 4x in HBM.
    x_rows = jnp.repeat(jnp.transpose(x, (0, 2, 3, 1)), 2, axis=2) \
                .reshape(N * H, W2, Cp)

    w2d = weight.reshape(Cp, Cs).T.astype(compute_dtype)    # (Cs, Cp)
    b2d = bias.reshape(1, Cp).astype(jnp.float32)

    total_rows = N * H2
    # bytes of block data per output spatial row: skip row + out row + half an x row
    row_bytes = W2 * (Cs * skip.dtype.itemsize
                      + Cp * jnp.dtype(out_dtype).itemsize
                      + (Cp * x.dtype.itemsize + 1) // 2)
    th = _pick_row_block(total_rows, row_bytes, block_bytes)

    out_rows = pl.pallas_call(
        _fpn_block_kernel,
        out_shape=jax.ShapeDtypeStruct((total_rows, W2, Cp), out_dtype),
        grid_spec=pltpu.PrefetchScalarGridSpec(
            num_scalar_prefetch=0,
            grid=(total_rows // th,),
            in_specs=[
                pl.BlockSpec((th, W2, Cs), lambda i: (i, 0, 0)),        # skip rows
                pl.BlockSpec((Cs, Cp), lambda i: (0, 0)),               # weight (resident)
                pl.BlockSpec((1, Cp), lambda i: (0, 0)),                # bias   (resident)
                pl.BlockSpec((th // 2, W2, Cp), lambda i: (i, 0, 0)),   # x rows (H-fold)
            ],
            out_specs=pl.BlockSpec((th, W2, Cp), lambda i: (i, 0, 0)),
        ),
        compiler_params=pltpu.CompilerParams(
            dimension_semantics=("parallel",)),
    )(skip_rows, w2d, b2d, x_rows)

    # back to NCHW for interface parity with the PyTorch module.
    return out_rows.reshape(N, H2, W2, Cp).transpose(0, 3, 1, 2)


if __name__ == "__main__":
    key = jax.random.PRNGKey(0)
    k_x, k_skip, k_w, k_b = jax.random.split(key, 4)

    N, Cp, Cs, H, W = 2, 8, 4, 8, 8          # x: (2,8,8,8), skip: (2,4,16,16)
    x = jax.random.normal(k_x, (N, Cp, H, W), dtype=jnp.float32)
    skip = jax.random.normal(k_skip, (N, Cs, 2 * H, 2 * W), dtype=jnp.float32)

    # deterministic Conv2d(Cs -> Cp, kernel_size=1) parameters
    weight = jax.random.normal(k_w, (Cp, Cs, 1, 1), dtype=jnp.float32) * 0.1
    bias = jax.random.normal(k_b, (Cp,), dtype=jnp.float32) * 0.1

    out = fpn_block(x, skip, weight, bias)
    jax.block_until_ready(out)

    # reference check in plain JAX
    x_up_ref = jnp.repeat(jnp.repeat(x, 2, axis=2), 2, axis=3)
    conv_ref = jnp.einsum("nchw,oc->nohw", skip, weight.reshape(Cp, Cs)) \
        + bias.reshape(1, Cp, 1, 1)
    ref = x_up_ref + conv_ref
    assert out.shape == (N, Cp, 2 * H, 2 * W)
    assert jnp.allclose(out, ref, atol=1e-5, rtol=1e-5)

    print("KERNEL_OK")
</pallas_src>

<mosaic_0001>
module attributes {stable_mosaic.version = 11 : i64} {
  func.func @_fpn_block_kernel(%arg0: i32, %arg1: memref<16x16x4xf32, #tpu.memory_space<vmem>>, %arg2: memref<4x8xf32, #tpu.memory_space<vmem>>, %arg3: memref<1x8xf32, #tpu.memory_space<vmem>>, %arg4: memref<8x16x8xf32, #tpu.memory_space<vmem>>, %arg5: memref<16x16x8xf32, #tpu.memory_space<vmem>>) attributes {dimension_semantics = [#tpu.dimension_semantics<parallel>], iteration_bounds = array<i64: 2>, scalar_prefetch = 0 : i64, scratch_operands = 0 : i64, tpu.core_type = #tpu.core_type<tc>, window_params = [{transform_indices = @transform_0, window_bounds = array<i64: 16, 16, 4>}, {pipeline_mode = #tpu.pipeline_mode<synchronous>, transform_indices = @transform_1, window_bounds = array<i64: 4, 8>}, {pipeline_mode = #tpu.pipeline_mode<synchronous>, transform_indices = @transform_2, window_bounds = array<i64: 1, 8>}, {transform_indices = @transform_3, window_bounds = array<i64: 8, 16, 8>}, {transform_indices = @transform_4, window_bounds = array<i64: 16, 16, 8>}]} {
    %c0 = arith.constant 0 : index
    %c0_0 = arith.constant 0 : index
    %c0_1 = arith.constant 0 : index
    %0 = vector.load %arg1[%c0, %c0_0, %c0_1] : memref<16x16x4xf32, #tpu.memory_space<vmem>>, vector<16x16x4xf32>
    %1 = vector.shape_cast %0 : vector<16x16x4xf32> to vector<256x4xf32>
    %c0_2 = arith.constant 0 : index
    %c0_3 = arith.constant 0 : index
    %2 = vector.load %arg2[%c0_2, %c0_3] : memref<4x8xf32, #tpu.memory_space<vmem>>, vector<4x8xf32>
    %cst = arith.constant dense<0.000000e+00> : vector<256x8xf32>
    %3 = tpu.matmul %1, %2, %cst {dimension_numbers = #tpu.dot_dimension_numbers<[1], [0], [0], [1], [0, 0, 1, 1], [], []>} : vector<256x4xf32>, vector<4x8xf32>, vector<256x8xf32> -> vector<256x8xf32>
    %c0_4 = arith.constant 0 : index
    %c0_5 = arith.constant 0 : index
    %4 = vector.load %arg3[%c0_4, %c0_5] : memref<1x8xf32, #tpu.memory_space<vmem>>, vector<1x8xf32>
    %5 = vector.broadcast %4 : vector<1x8xf32> to vector<256x8xf32>
    %6 = arith.addf %3, %5 : vector<256x8xf32>
    %7 = vector.shape_cast %6 : vector<256x8xf32> to vector<8x2x16x8xf32>
    %c0_6 = arith.constant 0 : index
    %c0_7 = arith.constant 0 : index
    %c0_8 = arith.constant 0 : index
    %8 = vector.load %arg4[%c0_6, %c0_7, %c0_8] : memref<8x16x8xf32, #tpu.memory_space<vmem>>, vector<8x16x8xf32>
    %9 = vector.shape_cast %8 : vector<8x16x8xf32> to vector<8x1x16x8xf32>
    %10 = vector.broadcast %9 : vector<8x1x16x8xf32> to vector<8x2x16x8xf32>
    %11 = arith.addf %7, %10 : vector<8x2x16x8xf32>
    %12 = vector.shape_cast %11 : vector<8x2x16x8xf32> to vector<16x16x8xf32>
    %c0_9 = arith.constant 0 : index
    %c0_10 = arith.constant 0 : index
    %c0_11 = arith.constant 0 : index
    %13 = vector.load %arg5[%c0_9, %c0_10, %c0_11] : memref<16x16x8xf32, #tpu.memory_space<vmem>>, vector<16x16x8xf32>
    tpu.vector_store %arg5[%c0_9, %c0_10, %c0_11], %12 {strides = array<i32>} : memref<16x16x8xf32, #tpu.memory_space<vmem>>, vector<16x16x8xf32>,
    return
  }
  func.func @transform_0(%arg0: i32) -> (i32, i32, i32) {
    %c0_i32 = arith.constant 0 : i32
    %c0_i32_0 = arith.constant 0 : i32
    %c0_i32_1 = arith.constant 0 : i32
    return %arg0, %c0_i32, %c0_i32_0 : i32, i32, i32
  }
  func.func @transform_1(%arg0: i32) -> (i32, i32) {
    %c0_i32 = arith.constant 0 : i32
    %c0_i32_0 = arith.constant 0 : i32
    %c0_i32_1 = arith.constant 0 : i32
    return %c0_i32, %c0_i32_0 : i32, i32
  }
  func.func @transform_2(%arg0: i32) -> (i32, i32) {
    %c0_i32 = arith.constant 0 : i32
    %c0_i32_0 = arith.constant 0 : i32
    %c0_i32_1 = arith.constant 0 : i32
    return %c0_i32, %c0_i32_0 : i32, i32
  }
  func.func @transform_3(%arg0: i32) -> (i32, i32, i32) {
    %c0_i32 = arith.constant 0 : i32
    %c0_i32_0 = arith.constant 0 : i32
    %c0_i32_1 = arith.constant 0 : i32
    return %arg0, %c0_i32, %c0_i32_0 : i32, i32, i32
  }
  func.func @transform_4(%arg0: i32) -> (i32, i32, i32) {
    %c0_i32 = arith.constant 0 : i32
    %c0_i32_0 = arith.constant 0 : i32
    %c0_i32_1 = arith.constant 0 : i32
    return %arg0, %c0_i32, %c0_i32_0 : i32, i32, i32
  }
}

</mosaic_0001>

<bundles_post_ra>
// kernel: tpu_custom_call.1
= control target key start
LH: loop header
LB: loop body
LE: loop exit
PB: predicated region body
PF: predicated region fallthrough
CT: control target
= control target key end

     0   :  { %s927_s15 = smov 0   ;;  %s1148_s0 = inlined_call_operand.vmem [shape: f32[32,16,4], index: 0, kind: input, shape index: {}]   ;;  %s1149_s1 = inlined_call_operand.vmem [shape: f32[4,8], index: 1, kind: input, shape index: {}]   ;;  %s1150_s2 = inlined_call_operand.vmem [shape: f32[1,8], index: 2, kind: input, shape index: {}]   ;;  %s1151_s3 = inlined_call_operand.vmem [shape: f32[16,16,8], index: 3, kind: input, shape index: {}]   ;;  %s1152_s4 = inlined_call_operand.vmem [shape: f32[32,16,8], index: 4, kind: output, shape index: {}]  }
   0x1 LB: > { %s748_s16 = sadd.s32 4294967295, %s900_s15   ;;  %p752_p0 = scmp.ge.s32.totalorder %s900_s15, 1  ;;  %s900_s15 = sphi %s927_s15, %s14_s15  }
   0x2   : > { %p176_p1 = scmp.lt.s32.totalorder %s900_s15, 3 }
   0x4   : > { %p177_p2 = pnand %p752_p0, %p176_p1 }
   0x5   : > { %v263_v0 = vld [vmem:[%s1149_s1] sm:$0xf] (!%p177_p2)  ;;  %vm368_vm0 = vcmask (!%p177_p2), 1043456   ;;  %s753_s19 = sshll.u32 (!%p177_p2), %s748_s16, 4  ;;  %vm271_vm1 = vcmask (!%p177_p2), 31744   ;;  %s756_s24 = sshll.u32 (!%p177_p2), %s748_s16, 3 }
   0x6   : > { %180 = sbr.rel (%p177_p2) target bundleno = 265 (0x109), region = 36  ;;  %834 = vmatprep.subr.msk.mxu0 (!%p177_p2), %vm368_vm0, %v263_v0  ;;  %884 = vmatprep.subr.msk.mxu1 (!%p177_p2), %vm368_vm0, %v263_v0  ;;  %p211_p3 = scmp.lt.s32.totalorder (!%p177_p2), %s753_s19, 31  ;;  %v1024_v33 = vld [vmem:[%s1150_s2] ss:$0 sm:$0xff] (!%p177_p2)  ;;  %vm645_vm2 = vcmask (!%p177_p2), 64512  }
   0x7   : > { %835 = vmatpush3.msk.msra.mxu0 (!%p177_p2), %vm368_vm0, %v263_v0  ;;  %885 = vmatpush3.msk.msra.mxu1 (!%p177_p2), %vm368_vm0, %v263_v0  ;;  %p218_p4 = scmp.lt.s32.totalorder (!%p177_p2), %s756_s24, 15 }
   0xd   : > { %s1154_s19 = smov (!%p211_p3, %s753_s19), 31  ;;  %s1156_s24 = smov (!%p218_p4, %s756_s24), 15 }
   0xe   : > { %s798_s20 = sshll.u32 %s1154_s19, 4  ;;  %s799_s25 = sshll.u32 %s1156_s24, 4 }
   0xf   : > { %s948_s23 = scalar_lea.vmem %s1148_s0, %s798_s20  ;;  %s1019_s28 = scalar_lea.vmem %s1151_s3, %s799_s25 }
  0x10   : > { %v231_v1 = vld [vmem:[%s948_s23] sm:$0xff]  ;;  %v232_v3 = vld [vmem:[%s948_s23 + $0x8] sm:$0xff]  ;;  %v233_v5 = vld [vmem:[%s948_s23 + $0x10] sm:$0xff]  ;;  %s1037_s7 = scalar_lea.vmem %s1152_s4, %s798_s20 }
  0x11   : > { %v247_v2 = vld [vmem:[%s948_s23 + $0x80] sm:$0xff]  ;;  %836 = vmatprep.mubr.msk.f32.mxu0 %vm271_vm1, %v231_v1  ;;  %v248_v4 = vld [vmem:[%s948_s23 + $0x88] sm:$0xff]  ;;  %v249_v6 = vld [vmem:[%s948_s23 + $0x90] sm:$0xff] }
  0x12   : > { %860 = vmatprep.mubr.msk.f32.mxu1 %vm271_vm1, %v247_v2  ;;  %837 = vmatmul.mubr.msk.f32.vlgmr.msra.gmra.mrb[0].mxu0 %vm271_vm1, %v232_v3  ;;  %v234_v7 = vld [vmem:[%s948_s23 + $0x18] sm:$0xff]  ;;  %v235_v9 = vld [vmem:[%s948_s23 + $0x20] sm:$0xff]  ;;  %v236_v11 = vld [vmem:[%s948_s23 + $0x28] sm:$0xff] }
  0x13   : > { %861 = vmatmul.mubr.msk.f32.vlgmr.msra.gmra.mrb[0].mxu1 %vm271_vm1, %v248_v4  ;;  %839 = vmatprep.mubr.msk.f32.mxu0 %vm271_vm1, %v233_v5  ;;  %v250_v8 = vld [vmem:[%s948_s23 + $0x98] sm:$0xff]  ;;  %v251_v10 = vld [vmem:[%s948_s23 + $0xa0] sm:$0xff]  ;;  %v252_v12 = vld [vmem:[%s948_s23 + $0xa8] sm:$0xff] }
  0x14   : > { %863 = vmatprep.mubr.msk.f32.mxu1 %vm271_vm1, %v249_v6  ;;  %v237_v13 = vld [vmem:[%s948_s23 + $0x30] sm:$0xff]  ;;  %v238_v15 = vld [vmem:[%s948_s23 + $0x38] sm:$0xff]  ;;  %v239_v17 = vld [vmem:[%s948_s23 + $0x40] sm:$0xff] }
  0x15   : > { %v253_v14 = vld [vmem:[%s948_s23 + $0xb0] sm:$0xff]  ;;  %v254_v16 = vld [vmem:[%s948_s23 + $0xb8] sm:$0xff]  ;;  %v255_v18 = vld [vmem:[%s948_s23 + $0xc0] sm:$0xff] }
  0x16   : > { %840 = vmatmul.mubr.msk.f32.gmra.mrb[2].mxu0 %vm271_vm1, %v234_v7  ;;  %v240_v19 = vld [vmem:[%s948_s23 + $0x48] sm:$0xff]  ;;  %v241_v21 = vld [vmem:[%s948_s23 + $0x50] sm:$0xff]  ;;  %v242_v23 = vld [vmem:[%s948_s23 + $0x58] sm:$0xff] }
  0x17   : > { %864 = vmatmul.mubr.msk.f32.gmra.mrb[2].mxu1 %vm271_vm1, %v250_v8  ;;  %842 = vmatprep.mubr.msk.f32.mxu0 %vm271_vm1, %v235_v9  ;;  %v256_v20 = vld [vmem:[%s948_s23 + $0xc8] sm:$0xff]  ;;  %v257_v22 = vld [vmem:[%s948_s23 + $0xd0] sm:$0xff]  ;;  %v258_v24 = vld [vmem:[%s948_s23 + $0xd8] sm:$0xff] }
  0x18   : > { %866 = vmatprep.mubr.msk.f32.mxu1 %vm271_vm1, %v251_v10  ;;  %v243_v25 = vld [vmem:[%s948_s23 + $0x60] sm:$0xff]  ;;  %v244_v27 = vld [vmem:[%s948_s23 + $0x68] sm:$0xff]  ;;  %v245_v29 = vld [vmem:[%s948_s23 + $0x70] sm:$0xff] }
  0x19   : > { %v259_v26 = vld [vmem:[%s948_s23 + $0xe0] sm:$0xff]  ;;  %v260_v28 = vld [vmem:[%s948_s23 + $0xe8] sm:$0xff]  ;;  %v261_v30 = vld [vmem:[%s948_s23 + $0xf0] sm:$0xff] }
  0x1a   : > { %843 = vmatmul.mubr.msk.f32.gmra.mrb[4].mxu0 %vm271_vm1, %v236_v11  ;;  %v246_v31 = vld [vmem:[%s948_s23 + $0x78] sm:$0xff]  ;;  %v598_v35 = vld [vmem:[%s1019_s28 + $0x8] sm:$0xff]  ;;  %v597_v41 = vld [vmem:[%s1019_s28] sm:$0xff] }
  0x1b   : > { %867 = vmatmul.mubr.msk.f32.gmra.mrb[4].mxu1 %vm271_vm1, %v252_v12  ;;  %845 = vmatprep.mubr.msk.f32.mxu0 %vm271_vm1, %v237_v13  ;;  %v262_v32 = vld [vmem:[%s948_s23 + $0xf8] sm:$0xff]  ;;  %v606_v37 = vld [vmem:[%s1019_s28 + $0x48] sm:$0xff]  ;;  %v605_v43 = vld [vmem:[%s1019_s28 + $0x40] sm:$0xff] }
  0x1c   : > { %869 = vmatprep.mubr.msk.f32.mxu1 %vm271_vm1, %v253_v14  ;;  %v600_v63 = vld [vmem:[%s1019_s28 + $0x18] sm:$0xff]  ;;  %v599_v5 = vld [vmem:[%s1019_s28 + $0x10] sm:$0xff] }
  0x1d   : > { %v608_v1 = vld [vmem:[%s1019_s28 + $0x58] sm:$0xff]  ;;  %v607_v7 = vld [vmem:[%s1019_s28 + $0x50] sm:$0xff] }
  0x1e   : > { %846 = vmatmul.mubr.msk.f32.gmra.mrb[6].mxu0 %vm271_vm1, %v238_v15 }
  0x1f   : > { %870 = vmatmul.mubr.msk.f32.gmra.mrb[6].mxu1 %vm271_vm1, %v254_v16  ;;  %848 = vmatprep.mubr.msk.f32.mxu0 %vm271_vm1, %v239_v17 }
  0x20   : > { %872 = vmatprep.mubr.msk.f32.mxu1 %vm271_vm1, %v255_v18 }
  0x22   : > { %849 = vmatmul.mubr.msk.f32.gmra.mrb[8].mxu0 %vm271_vm1, %v240_v19 }
  0x23   : > { %873 = vmatmul.mubr.msk.f32.gmra.mrb[8].mxu1 %vm271_vm1, %v256_v20  ;;  %851 = vmatprep.mubr.msk.f32.mxu0 %vm271_vm1, %v241_v21 }
  0x24   : > { %875 = vmatprep.mubr.msk.f32.mxu1 %vm271_vm1, %v257_v22 }
  0x26   : > { %852 = vmatmul.mubr.msk.f32.gmra.mrb[10].mxu0 %vm271_vm1, %v242_v23 }
  0x27   : > { %876 = vmatmul.mubr.msk.f32.gmra.mrb[10].mxu1 %vm271_vm1, %v258_v24  ;;  %854 = vmatprep.mubr.msk.f32.mxu0 %vm271_vm1, %v243_v25 }
  0x28   : > { %878 = vmatprep.mubr.msk.f32.mxu1 %vm271_vm1, %v259_v26 }
  0x2a   : > { %855 = vmatmul.mubr.msk.f32.gmra.mrb[12].mxu0 %vm271_vm1, %v244_v27  ;;  %v602_v27 = vld [vmem:[%s1019_s28 + $0x28] sm:$0xff] }
  0x2b   : > { %879 = vmatmul.mubr.msk.f32.gmra.mrb[12].mxu1 %vm271_vm1, %v260_v28  ;;  %857 = vmatprep.mubr.msk.f32.mxu0 %vm271_vm1, %v245_v29  ;;  %v610_v29 = vld [vmem:[%s1019_s28 + $0x68] sm:$0xff] }
  0x2c   : > { %881 = vmatprep.mubr.msk.f32.mxu1 %vm271_vm1, %v261_v30 }
  0x2e   : > { %858 = vmatmul.mubr.msk.f32.gmra.mrb[14].mxu0 %vm271_vm1, %v246_v31 }
  0x2f   : > { %882 = vmatmul.mubr.msk.f32.gmra.mrb[14].mxu1 %vm271_vm1, %v262_v32 }
  0xe5   : > { %v838_v34 = vpop.f32.mrb[0].mxu0 }
  0xe6   : > { %v862_v36 = vpop.f32.mrb[0].mxu1  ;;  %v444_v38 = vadd.f32 %v838_v34, %v1024_v33  ;;  %v438_v40 = vpop.f32.mrb[1].mxu0  ;;  %v601_v34 = vld [vmem:[%s1019_s28 + $0x20] sm:$0xff] }
  0xe7   : > { %v524_v39 = vadd.f32 %v862_v36, %v1024_v33  ;;  %v518_v42 = vpop.f32.mrb[1].mxu1  ;;  %v439_v44 = vadd.f32 %v1024_v33, %v438_v40  ;;  %v609_v36 = vld [vmem:[%s1019_s28 + $0x60] sm:$0xff] }
  0xe8   : > { %v519_v45 = vadd.f32 %v1024_v33, %v518_v42  ;;  %v614_v46 = vadd.f32 %v598_v35, %v444_v38 }
  0xe9   : > { %v630_v47 = vadd.f32 %v606_v37, %v524_v39  ;;  %v613_v48 = vadd.f32 %v597_v41, %v439_v44  ;;  %v841_v50 = vpop.f32.mrb[2].mxu0 }
  0xea   : > { %v629_v49 = vadd.f32 %v605_v43, %v519_v45  ;;  %v865_v51 = vpop.f32.mrb[2].mxu1  ;;  %647 = vst.msk [vmem:[%s1037_s7 + $0x8] sm:$0xff] %vm645_vm2, %v614_v46  ;;  %v454_v52 = vadd.f32 %v841_v50, %v1024_v33  ;;  %v448_v54 = vpop.f32.mrb[3].mxu0 }
  0xeb   : > { %663 = vst.msk [vmem:[%s1037_s7 + $0x88] sm:$0xff] %vm645_vm2, %v630_v47  ;;  %v534_v53 = vadd.f32 %v865_v51, %v1024_v33  ;;  %v528_v55 = vpop.f32.mrb[3].mxu1  ;;  %646 = vst.msk [vmem:[%s1037_s7] sm:$0xff] %vm645_vm2, %v613_v48  ;;  %v449_v56 = vadd.f32 %v1024_v33, %v448_v54 }
  0xec   : > { %662 = vst.msk [vmem:[%s1037_s7 + $0x80] sm:$0xff] %vm645_vm2, %v629_v49  ;;  %v529_v57 = vadd.f32 %v1024_v33, %v528_v55  ;;  %v616_v58 = vadd.f32 %v598_v35, %v454_v52 }
  0xed   : > { %v632_v59 = vadd.f32 %v606_v37, %v534_v53  ;;  %v615_v60 = vadd.f32 %v597_v41, %v449_v56  ;;  %v844_v62 = vpop.f32.mrb[4].mxu0  ;;  %v604_v56 = vld [vmem:[%s1019_s28 + $0x38] sm:$0xff] }
  0xee   : > { %v631_v61 = vadd.f32 %v605_v43, %v529_v57  ;;  %v868_v0 = vpop.f32.mrb[4].mxu1  ;;  %649 = vst.msk [vmem:[%s1037_s7 + $0x18] sm:$0xff] %vm645_vm2, %v616_v58  ;;  %v464_v2 = vadd.f32 %v844_v62, %v1024_v33  ;;  %v458_v4 = vpop.f32.mrb[5].mxu0  ;;  %v612_v58 = vld [vmem:[%s1019_s28 + $0x78] sm:$0xff]  ;;  %v603_v62 = vld [vmem:[%s1019_s28 + $0x30] sm:$0xff] }
  0xef   : > { %665 = vst.msk [vmem:[%s1037_s7 + $0x98] sm:$0xff] %vm645_vm2, %v632_v59  ;;  %v544_v3 = vadd.f32 %v868_v0, %v1024_v33  ;;  %v538_v6 = vpop.f32.mrb[5].mxu1  ;;  %648 = vst.msk [vmem:[%s1037_s7 + $0x10] sm:$0xff] %vm645_vm2, %v615_v60  ;;  %v459_v8 = vadd.f32 %v1024_v33, %v458_v4  ;;  %v611_v0 = vld [vmem:[%s1019_s28 + $0x70] sm:$0xff] }
  0xf0   : > { %664 = vst.msk [vmem:[%s1037_s7 + $0x90] sm:$0xff] %vm645_vm2, %v631_v61  ;;  %v539_v9 = vadd.f32 %v1024_v33, %v538_v6  ;;  %v618_v10 = vadd.f32 %v600_v63, %v464_v2 }
  0xf1   : > { %v634_v11 = vadd.f32 %v608_v1, %v544_v3  ;;  %v617_v12 = vadd.f32 %v599_v5, %v459_v8  ;;  %v847_v14 = vpop.f32.mrb[6].mxu0 }
  0xf2   : > { %v633_v13 = vadd.f32 %v607_v7, %v539_v9  ;;  %v871_v15 = vpop.f32.mrb[6].mxu1  ;;  %651 = vst.msk [vmem:[%s1037_s7 + $0x28] sm:$0xff] %vm645_vm2, %v618_v10  ;;  %v474_v16 = vadd.f32 %v847_v14, %v1024_v33  ;;  %v468_v18 = vpop.f32.mrb[7].mxu0 }
  0xf3   : > { %667 = vst.msk [vmem:[%s1037_s7 + $0xa8] sm:$0xff] %vm645_vm2, %v634_v11  ;;  %v554_v17 = vadd.f32 %v871_v15, %v1024_v33  ;;  %v548_v19 = vpop.f32.mrb[7].mxu1  ;;  %650 = vst.msk [vmem:[%s1037_s7 + $0x20] sm:$0xff] %vm645_vm2, %v617_v12  ;;  %v469_v20 = vadd.f32 %v1024_v33, %v468_v18 }
  0xf4   : > { %666 = vst.msk [vmem:[%s1037_s7 + $0xa0] sm:$0xff] %vm645_vm2, %v633_v13  ;;  %v549_v21 = vadd.f32 %v1024_v33, %v548_v19  ;;  %v620_v22 = vadd.f32 %v600_v63, %v474_v16 }
  0xf5   : > { %v636_v23 = vadd.f32 %v608_v1, %v554_v17  ;;  %v619_v24 = vadd.f32 %v599_v5, %v469_v20  ;;  %v850_v26 = vpop.f32.mrb[8].mxu0 }
  0xf6   : > { %v635_v25 = vadd.f32 %v607_v7, %v549_v21  ;;  %v874_v28 = vpop.f32.mrb[8].mxu1  ;;  %653 = vst.msk [vmem:[%s1037_s7 + $0x38] sm:$0xff] %vm645_vm2, %v620_v22  ;;  %v484_v30 = vadd.f32 %v850_v26, %v1024_v33  ;;  %v478_v32 = vpop.f32.mrb[9].mxu0 }
  0xf7   : > { %669 = vst.msk [vmem:[%s1037_s7 + $0xb8] sm:$0xff] %vm645_vm2, %v636_v23  ;;  %v564_v31 = vadd.f32 %v874_v28, %v1024_v33  ;;  %v558_v35 = vpop.f32.mrb[9].mxu1  ;;  %652 = vst.msk [vmem:[%s1037_s7 + $0x30] sm:$0xff] %vm645_vm2, %v619_v24  ;;  %v479_v37 = vadd.f32 %v1024_v33, %v478_v32 }
  0xf8   : > { %668 = vst.msk [vmem:[%s1037_s7 + $0xb0] sm:$0xff] %vm645_vm2, %v635_v25  ;;  %v559_v38 = vadd.f32 %v1024_v33, %v558_v35  ;;  %v622_v39 = vadd.f32 %v602_v27, %v484_v30 }
  0xf9   : > { %v638_v40 = vadd.f32 %v610_v29, %v564_v31  ;;  %v621_v41 = vadd.f32 %v601_v34, %v479_v37  ;;  %v853_v43 = vpop.f32.mrb[10].mxu0 }
  0xfa   : > { %v637_v42 = vadd.f32 %v609_v36, %v559_v38  ;;  %v877_v44 = vpop.f32.mrb[10].mxu1  ;;  %655 = vst.msk [vmem:[%s1037_s7 + $0x48] sm:$0xff] %vm645_vm2, %v622_v39  ;;  %v494_v45 = vadd.f32 %v853_v43, %v1024_v33  ;;  %v488_v47 = vpop.f32.mrb[11].mxu0 }
  0xfb   : > { %671 = vst.msk [vmem:[%s1037_s7 + $0xc8] sm:$0xff] %vm645_vm2, %v638_v40  ;;  %v574_v46 = vadd.f32 %v877_v44, %v1024_v33  ;;  %v568_v48 = vpop.f32.mrb[11].mxu1  ;;  %654 = vst.msk [vmem:[%s1037_s7 + $0x40] sm:$0xff] %vm645_vm2, %v621_v41  ;;  %v489_v49 = vadd.f32 %v1024_v33, %v488_v47 }
  0xfc   : > { %670 = vst.msk [vmem:[%s1037_s7 + $0xc0] sm:$0xff] %vm645_vm2, %v637_v42  ;;  %v569_v50 = vadd.f32 %v1024_v33, %v568_v48  ;;  %v624_v51 = vadd.f32 %v602_v27, %v494_v45 }
  0xfd   : > { %v640_v52 = vadd.f32 %v610_v29, %v574_v46  ;;  %v623_v53 = vadd.f32 %v601_v34, %v489_v49  ;;  %v856_v55 = vpop.f32.mrb[12].mxu0 }
  0xfe   : > { %v639_v54 = vadd.f32 %v609_v36, %v569_v50  ;;  %v880_v57 = vpop.f32.mrb[12].mxu1  ;;  %657 = vst.msk [vmem:[%s1037_s7 + $0x58] sm:$0xff] %vm645_vm2, %v624_v51  ;;  %v504_v59 = vadd.f32 %v856_v55, %v1024_v33  ;;  %v498_v61 = vpop.f32.mrb[13].mxu0 }
  0xff   : > { %673 = vst.msk [vmem:[%s1037_s7 + $0xd8] sm:$0xff] %vm645_vm2, %v640_v52  ;;  %v584_v60 = vadd.f32 %v880_v57, %v1024_v33  ;;  %v578_v63 = vpop.f32.mrb[13].mxu1  ;;  %656 = vst.msk [vmem:[%s1037_s7 + $0x50] sm:$0xff] %vm645_vm2, %v623_v53  ;;  %v499_v1 = vadd.f32 %v1024_v33, %v498_v61 }
 0x100   : > { %672 = vst.msk [vmem:[%s1037_s7 + $0xd0] sm:$0xff] %vm645_vm2, %v639_v54  ;;  %v579_v2 = vadd.f32 %v1024_v33, %v578_v63  ;;  %v626_v3 = vadd.f32 %v604_v56, %v504_v59 }
 0x101   : > { %v642_v4 = vadd.f32 %v612_v58, %v584_v60  ;;  %v625_v5 = vadd.f32 %v603_v62, %v499_v1  ;;  %v859_v7 = vpop.f32.mrb[14].mxu0 }
 0x102   : > { %v641_v6 = vadd.f32 %v611_v0, %v579_v2  ;;  %v883_v8 = vpop.f32.mrb[14].mxu1  ;;  %659 = vst.msk [vmem:[%s1037_s7 + $0x68] sm:$0xff] %vm645_vm2, %v626_v3  ;;  %v514_v9 = vadd.f32 %v859_v7, %v1024_v33  ;;  %v508_v11 = vpop.f32.mrb[15].mxu0 }
 0x103   : > { %675 = vst.msk [vmem:[%s1037_s7 + $0xe8] sm:$0xff] %vm645_vm2, %v642_v4  ;;  %v594_v10 = vadd.f32 %v883_v8, %v1024_v33  ;;  %v588_v12 = vpop.f32.mrb[15].mxu1  ;;  %658 = vst.msk [vmem:[%s1037_s7 + $0x60] sm:$0xff] %vm645_vm2, %v625_v5  ;;  %v509_v13 = vadd.f32 %v1024_v33, %v508_v11 }
 0x104   : > { %674 = vst.msk [vmem:[%s1037_s7 + $0xe0] sm:$0xff] %vm645_vm2, %v641_v6  ;;  %v589_v14 = vadd.f32 %v1024_v33, %v588_v12  ;;  %v628_v15 = vadd.f32 %v604_v56, %v514_v9 }
 0x105   : > { %v644_v16 = vadd.f32 %v612_v58, %v594_v10  ;;  %v627_v17 = vadd.f32 %v603_v62, %v509_v13 }
 0x106   : > { %v643_v18 = vadd.f32 %v611_v0, %v589_v14  ;;  %661 = vst.msk [vmem:[%s1037_s7 + $0x78] sm:$0xff] %vm645_vm2, %v628_v15 }
 0x107   : > { %677 = vst.msk [vmem:[%s1037_s7 + $0xf8] sm:$0xff] %vm645_vm2, %v644_v16  ;;  %660 = vst.msk [vmem:[%s1037_s7 + $0x70] sm:$0xff] %vm645_vm2, %v627_v17 }
 0x108   : > { %676 = vst.msk [vmem:[%s1037_s7 + $0xf0] sm:$0xff] %vm645_vm2, %v643_v18 }
 0x109 PF: > { %s14_s15 = sadd.s32 1, %s900_s15  }
 0x10a   : > { %p11_p5 = scmp.ge.s32.totalorder %s14_s15, 4  }
 0x10c   :  { %13 = sbr.rel (!%p11_p5) target bundleno = 1 (0x1), region = 69 }

</bundles_post_ra>
